<compile_context>
chip_gen: v7x
topology: tpu7x:2x2x1
jax: 0.10.0
libtpu: 0.0.40
codegen_flags: <defaults>
</compile_context>

<pallas_src>
import jax
import jax.numpy as jnp
from jax.experimental import pallas as pl
from jax.experimental.pallas import tpu as pltpu

EPS = 1e-5          # nn.BatchNorm1d default eps
NEG_SLOPE = 0.01    # nn.LeakyReLU default negative_slope
LANE = 128


def _round_up(a, m):
    return (a + m - 1) // m * m


def _leaky_relu(x):
    return jnp.where(x > 0, x, NEG_SLOPE * x)


# ----------------------------------------------------------------------------
# Kernel: one batch tile per grid step.  BatchNorm is pre-folded into W/b.
# ----------------------------------------------------------------------------
def mlp_kernel(x_ref, w1_ref, b1_ref, w2_ref, b2_ref, w3_ref, b3_ref, o_ref):
    # ---- Linear 1 (BN folded) + LeakyReLU ---------------------------------
    h = jnp.dot(x_ref[...], w1_ref[...], preferred_element_type=jnp.float32)
    h = _leaky_relu(h + b1_ref[...])                      # f32 elementwise

    # ---- Linear 2 (BN folded) + LeakyReLU ---------------------------------
    h = jnp.dot(h.astype(jnp.bfloat16), w2_ref[...],
                preferred_element_type=jnp.float32)
    h = _leaky_relu(h + b2_ref[...])

    # ---- Dropout (eval mode => identity) + final Linear (lane-padded) -----
    # TODO(synk): training-mode stochastic dropout (p=0.5) not implemented;
    # eval-mode (identity) semantics are reproduced here.
    o = jnp.dot(h.astype(jnp.bfloat16), w3_ref[...],
                preferred_element_type=jnp.float32)
    o_ref[...] = o + b3_ref[...]


# ----------------------------------------------------------------------------
# Wrapper-side parameter prep: fold BN into Linear, pad output to 128 lanes,
# cast weights to bf16 (biases stay f32).
# ----------------------------------------------------------------------------
def fold_params(params, n_classes):
    (w1, b1, g1, beta1, m1, v1,
     w2, b2, g2, beta2, m2, v2,
     w3, b3) = params

    s1 = g1 * jax.lax.rsqrt(v1 + EPS)                 # (1, F1)
    w1f = (w1 * s1).astype(jnp.bfloat16)              # (D, F1)
    b1f = (b1 - m1) * s1 + beta1                      # (1, F1) f32

    s2 = g2 * jax.lax.rsqrt(v2 + EPS)
    w2f = (w2 * s2).astype(jnp.bfloat16)              # (F1, F2)
    b2f = (b2 - m2) * s2 + beta2                      # (1, F2) f32

    n_pad = _round_up(n_classes, LANE)                # lane-dense output
    w3f = jnp.zeros((w3.shape[0], n_pad), jnp.float32)
    w3f = w3f.at[:, :n_classes].set(w3).astype(jnp.bfloat16)
    b3f = jnp.zeros((1, n_pad), jnp.float32).at[:, :n_classes].set(b3)

    return w1f, b1f, w2f, b2f, w3f, b3f


def _pick_batch_tile(B, D, NP, budget_bytes=8 << 20):
    """Largest batch tile (multiple of 16, <=1024) whose double-buffered x and
    output tiles fit a conservative per-step VMEM budget."""
    per_row = 2 * (D * 2) + 2 * (NP * 4)   # bf16 x (x2 buf) + f32 out (x2 buf)
    tb = (budget_bytes // per_row) // 16 * 16
    tb = max(16, min(1024, tb))
    return min(tb, _round_up(B, 16))


def mlp_classifier_forward(x_nchw, params, n_classes):
    """x_nchw: (B, C, H, W) float32.  Returns logits (B, n_classes) float32."""
    B = x_nchw.shape[0]
    x = x_nchw.reshape(B, -1).astype(jnp.bfloat16)    # nn.Flatten (glue) + bf16
    D = x.shape[1]

    w1f, b1f, w2f, b2f, w3f, b3f = fold_params(params, n_classes)
    F1, F2, NP = w1f.shape[1], w2f.shape[1], w3f.shape[1]

    TB = _pick_batch_tile(B, D, NP)
    B_pad = _round_up(B, TB)
    if B_pad != B:
        x = jnp.pad(x, ((0, B_pad - B), (0, 0)))

    out = pl.pallas_call(
        mlp_kernel,
        out_shape=jax.ShapeDtypeStruct((B_pad, NP), jnp.float32),
        grid=(B_pad // TB,),
        in_specs=[
            pl.BlockSpec((TB, D), lambda i: (i, 0)),     # x: tiled over batch
            pl.BlockSpec((D, F1), lambda i: (0, 0)),     # weights: VMEM-resident
            pl.BlockSpec((1, F1), lambda i: (0, 0)),
            pl.BlockSpec((F1, F2), lambda i: (0, 0)),
            pl.BlockSpec((1, F2), lambda i: (0, 0)),
            pl.BlockSpec((F2, NP), lambda i: (0, 0)),
            pl.BlockSpec((1, NP), lambda i: (0, 0)),
        ],
        out_specs=pl.BlockSpec((TB, NP), lambda i: (i, 0)),
        compiler_params=pltpu.CompilerParams(
            dimension_semantics=("parallel",)),           # 2x on v7x megacore
    )(x, w1f, b1f, w2f, b2f, w3f, b3f)

    return out[:B, :n_classes]


# ----------------------------------------------------------------------------
# Parameter init + references
# ----------------------------------------------------------------------------
def init_params(key, input_sz, n_classes, n_features=(16, 32)):
    """Deterministic synthetic parameters (PyTorch-Linear-like uniform init)."""
    f1, f2 = n_features
    ks = jax.random.split(key, 10)

    def lin(kw, kb, fan_in, fan_out):
        bound = 1.0 / jnp.sqrt(fan_in)
        w = jax.random.uniform(kw, (fan_in, fan_out), jnp.float32, -bound, bound)
        b = jax.random.uniform(kb, (1, fan_out), jnp.float32, -bound, bound)
        return w, b

    w1, b1 = lin(ks[0], ks[1], input_sz, f1)
    w2, b2 = lin(ks[2], ks[3], f1, f2)
    w3, b3 = lin(ks[4], ks[5], f2, n_classes)

    g1, beta1 = jnp.ones((1, f1), jnp.float32), jnp.zeros((1, f1), jnp.float32)
    g2, beta2 = jnp.ones((1, f2), jnp.float32), jnp.zeros((1, f2), jnp.float32)
    m1 = 0.1 * jax.random.normal(ks[6], (1, f1), jnp.float32)
    v1 = 1.0 + 0.1 * jax.random.uniform(ks[7], (1, f1), jnp.float32)
    m2 = 0.1 * jax.random.normal(ks[8], (1, f2), jnp.float32)
    v2 = 1.0 + 0.1 * jax.random.uniform(ks[9], (1, f2), jnp.float32)

    return (w1, b1, g1, beta1, m1, v1,
            w2, b2, g2, beta2, m2, v2,
            w3, b3)


def reference_forward_f32(x_nchw, params):
    """Pure-JAX f32 reference of the eval-mode PyTorch forward."""
    (w1, b1, g1, beta1, m1, v1,
     w2, b2, g2, beta2, m2, v2,
     w3, b3) = params
    x = x_nchw.reshape(x_nchw.shape[0], -1).astype(jnp.float32)
    h = x @ w1 + b1
    h = (h - m1) / jnp.sqrt(v1 + EPS) * g1 + beta1
    h = jnp.where(h > 0, h, NEG_SLOPE * h)
    h = h @ w2 + b2
    h = (h - m2) / jnp.sqrt(v2 + EPS) * g2 + beta2
    h = jnp.where(h > 0, h, NEG_SLOPE * h)
    return h @ w3 + b3


def reference_forward_bf16(x_nchw, params, n_classes):
    """Pure-JAX reference using the same BN-folded bf16 weights as the kernel."""
    w1f, b1f, w2f, b2f, w3f, b3f = fold_params(params, n_classes)
    x = x_nchw.reshape(x_nchw.shape[0], -1).astype(jnp.bfloat16)
    h = jnp.dot(x, w1f, preferred_element_type=jnp.float32) + b1f
    h = jnp.where(h > 0, h, NEG_SLOPE * h)
    h = jnp.dot(h.astype(jnp.bfloat16), w2f,
                preferred_element_type=jnp.float32) + b2f
    h = jnp.where(h > 0, h, NEG_SLOPE * h)
    o = jnp.dot(h.astype(jnp.bfloat16), w3f,
                preferred_element_type=jnp.float32) + b3f
    return o[:, :n_classes]


if __name__ == "__main__":
    key = jax.random.PRNGKey(0)
    k_x, k_p = jax.random.split(key)

    B, C, H, W = 2, 4, 16, 16          # small NCHW image batch
    n_classes = 10
    input_sz = C * H * W               # 1024

    x = jax.random.normal(k_x, (B, C, H, W), jnp.float32)
    params = init_params(k_p, input_sz, n_classes, n_features=(16, 32))

    out = mlp_classifier_forward(x, params, n_classes)
    out = jax.block_until_ready(out)
    assert out.shape == (B, n_classes)

    # Tight check vs. a plain-JAX path with the identical bf16/folded params.
    ref_bf16 = reference_forward_bf16(x, params, n_classes)
    assert jnp.allclose(out, ref_bf16, atol=5e-3, rtol=5e-3), \
        "mismatch vs bf16-folded reference"

    # Loose check vs. the full-f32 eval-mode PyTorch-equivalent forward
    # (tolerance accounts for the intentional bf16 weight/activation cast).
    ref_f32 = reference_forward_f32(x, params)
    assert jnp.allclose(out, ref_f32, atol=5e-2, rtol=5e-2), \
        "mismatch vs f32 reference"

    print("KERNEL_OK")
</pallas_src>

<mosaic_0001>
module attributes {stable_mosaic.version = 11 : i64} {
  func.func @mlp_kernel(%arg0: i32, %arg1: memref<16x1024xbf16, #tpu.memory_space<vmem>>, %arg2: memref<1024x16xbf16, #tpu.memory_space<vmem>>, %arg3: memref<1x16xf32, #tpu.memory_space<vmem>>, %arg4: memref<16x32xbf16, #tpu.memory_space<vmem>>, %arg5: memref<1x32xf32, #tpu.memory_space<vmem>>, %arg6: memref<32x128xbf16, #tpu.memory_space<vmem>>, %arg7: memref<1x128xf32, #tpu.memory_space<vmem>>, %arg8: memref<16x128xf32, #tpu.memory_space<vmem>>) attributes {dimension_semantics = [#tpu.dimension_semantics<parallel>], iteration_bounds = array<i64: 1>, scalar_prefetch = 0 : i64, scratch_operands = 0 : i64, tpu.core_type = #tpu.core_type<tc>, window_params = [{transform_indices = @transform_0, window_bounds = array<i64: 16, 1024>}, {pipeline_mode = #tpu.pipeline_mode<synchronous>, transform_indices = @transform_1, window_bounds = array<i64: 1024, 16>}, {pipeline_mode = #tpu.pipeline_mode<synchronous>, transform_indices = @transform_2, window_bounds = array<i64: 1, 16>}, {pipeline_mode = #tpu.pipeline_mode<synchronous>, transform_indices = @transform_3, window_bounds = array<i64: 16, 32>}, {pipeline_mode = #tpu.pipeline_mode<synchronous>, transform_indices = @transform_4, window_bounds = array<i64: 1, 32>}, {pipeline_mode = #tpu.pipeline_mode<synchronous>, transform_indices = @transform_5, window_bounds = array<i64: 32, 128>}, {pipeline_mode = #tpu.pipeline_mode<synchronous>, transform_indices = @transform_6, window_bounds = array<i64: 1, 128>}, {transform_indices = @transform_7, window_bounds = array<i64: 16, 128>}]} {
    %c0 = arith.constant 0 : index
    %c0_0 = arith.constant 0 : index
    %0 = vector.load %arg1[%c0, %c0_0] : memref<16x1024xbf16, #tpu.memory_space<vmem>>, vector<16x1024xbf16>
    %c0_1 = arith.constant 0 : index
    %c0_2 = arith.constant 0 : index
    %1 = vector.load %arg2[%c0_1, %c0_2] : memref<1024x16xbf16, #tpu.memory_space<vmem>>, vector<1024x16xbf16>
    %cst = arith.constant dense<0.000000e+00> : vector<16x16xf32>
    %2 = tpu.matmul %0, %1, %cst {dimension_numbers = #tpu.dot_dimension_numbers<[1], [0], [0], [1], [0, 0, 1, 1], [], []>} : vector<16x1024xbf16>, vector<1024x16xbf16>, vector<16x16xf32> -> vector<16x16xf32>
    %c0_3 = arith.constant 0 : index
    %c0_4 = arith.constant 0 : index
    %3 = vector.load %arg3[%c0_3, %c0_4] : memref<1x16xf32, #tpu.memory_space<vmem>>, vector<1x16xf32>
    %4 = vector.broadcast %3 : vector<1x16xf32> to vector<16x16xf32>
    %5 = arith.addf %2, %4 : vector<16x16xf32>
    %cst_5 = arith.constant 0.000000e+00 : f32
    %6 = vector.broadcast %cst_5 : f32 to vector<16x16xf32>
    %7 = arith.cmpf ogt, %5, %6 : vector<16x16xf32>
    %cst_6 = arith.constant 0.00999999977 : f32
    %8 = vector.broadcast %cst_6 : f32 to vector<16x16xf32>
    %9 = arith.mulf %8, %5 : vector<16x16xf32>
    %10 = arith.select %7, %5, %9 : vector<16x16xi1>, vector<16x16xf32>
    %11 = arith.truncf %10 : vector<16x16xf32> to vector<16x16xbf16>
    %c0_7 = arith.constant 0 : index
    %c0_8 = arith.constant 0 : index
    %12 = vector.load %arg4[%c0_7, %c0_8] : memref<16x32xbf16, #tpu.memory_space<vmem>>, vector<16x32xbf16>
    %cst_9 = arith.constant dense<0.000000e+00> : vector<16x32xf32>
    %13 = tpu.matmul %11, %12, %cst_9 {dimension_numbers = #tpu.dot_dimension_numbers<[1], [0], [0], [1], [0, 0, 1, 1], [], []>} : vector<16x16xbf16>, vector<16x32xbf16>, vector<16x32xf32> -> vector<16x32xf32>
    %c0_10 = arith.constant 0 : index
    %c0_11 = arith.constant 0 : index
    %14 = vector.load %arg5[%c0_10, %c0_11] : memref<1x32xf32, #tpu.memory_space<vmem>>, vector<1x32xf32>
    %15 = vector.broadcast %14 : vector<1x32xf32> to vector<16x32xf32>
    %16 = arith.addf %13, %15 : vector<16x32xf32>
    %cst_12 = arith.constant 0.000000e+00 : f32
    %17 = vector.broadcast %cst_12 : f32 to vector<16x32xf32>
    %18 = arith.cmpf ogt, %16, %17 : vector<16x32xf32>
    %cst_13 = arith.constant 0.00999999977 : f32
    %19 = vector.broadcast %cst_13 : f32 to vector<16x32xf32>
    %20 = arith.mulf %19, %16 : vector<16x32xf32>
    %21 = arith.select %18, %16, %20 : vector<16x32xi1>, vector<16x32xf32>
    %22 = arith.truncf %21 : vector<16x32xf32> to vector<16x32xbf16>
    %c0_14 = arith.constant 0 : index
    %c0_15 = arith.constant 0 : index
    %23 = vector.load %arg6[%c0_14, %c0_15] : memref<32x128xbf16, #tpu.memory_space<vmem>>, vector<32x128xbf16>
    %cst_16 = arith.constant dense<0.000000e+00> : vector<16x128xf32>
    %24 = tpu.matmul %22, %23, %cst_16 {dimension_numbers = #tpu.dot_dimension_numbers<[1], [0], [0], [1], [0, 0, 1, 1], [], []>} : vector<16x32xbf16>, vector<32x128xbf16>, vector<16x128xf32> -> vector<16x128xf32>
    %c0_17 = arith.constant 0 : index
    %c0_18 = arith.constant 0 : index
    %25 = vector.load %arg7[%c0_17, %c0_18] : memref<1x128xf32, #tpu.memory_space<vmem>>, vector<1x128xf32>
    %26 = vector.broadcast %25 : vector<1x128xf32> to vector<16x128xf32>
    %27 = arith.addf %24, %26 : vector<16x128xf32>
    %c0_19 = arith.constant 0 : index
    %c0_20 = arith.constant 0 : index
    %28 = vector.load %arg8[%c0_19, %c0_20] : memref<16x128xf32, #tpu.memory_space<vmem>>, vector<16x128xf32>
    tpu.vector_store %arg8[%c0_19, %c0_20], %27 {strides = array<i32>} : memref<16x128xf32, #tpu.memory_space<vmem>>, vector<16x128xf32>,
    return
  }
  func.func @transform_0(%arg0: i32) -> (i32, i32) {
    %c0_i32 = arith.constant 0 : i32
    %c0_i32_0 = arith.constant 0 : i32
    return %arg0, %c0_i32 : i32, i32
  }
  func.func @transform_1(%arg0: i32) -> (i32, i32) {
    %c0_i32 = arith.constant 0 : i32
    %c0_i32_0 = arith.constant 0 : i32
    %c0_i32_1 = arith.constant 0 : i32
    return %c0_i32, %c0_i32_0 : i32, i32
  }
  func.func @transform_2(%arg0: i32) -> (i32, i32) {
    %c0_i32 = arith.constant 0 : i32
    %c0_i32_0 = arith.constant 0 : i32
    %c0_i32_1 = arith.constant 0 : i32
    return %c0_i32, %c0_i32_0 : i32, i32
  }
  func.func @transform_3(%arg0: i32) -> (i32, i32) {
    %c0_i32 = arith.constant 0 : i32
    %c0_i32_0 = arith.constant 0 : i32
    %c0_i32_1 = arith.constant 0 : i32
    return %c0_i32, %c0_i32_0 : i32, i32
  }
  func.func @transform_4(%arg0: i32) -> (i32, i32) {
    %c0_i32 = arith.constant 0 : i32
    %c0_i32_0 = arith.constant 0 : i32
    %c0_i32_1 = arith.constant 0 : i32
    return %c0_i32, %c0_i32_0 : i32, i32
  }
  func.func @transform_5(%arg0: i32) -> (i32, i32) {
    %c0_i32 = arith.constant 0 : i32
    %c0_i32_0 = arith.constant 0 : i32
    %c0_i32_1 = arith.constant 0 : i32
    return %c0_i32, %c0_i32_0 : i32, i32
  }
  func.func @transform_6(%arg0: i32) -> (i32, i32) {
    %c0_i32 = arith.constant 0 : i32
    %c0_i32_0 = arith.constant 0 : i32
    %c0_i32_1 = arith.constant 0 : i32
    return %c0_i32, %c0_i32_0 : i32, i32
  }
  func.func @transform_7(%arg0: i32) -> (i32, i32) {
    %c0_i32 = arith.constant 0 : i32
    %c0_i32_0 = arith.constant 0 : i32
    return %arg0, %c0_i32 : i32, i32
  }
}

</mosaic_0001>

<bundles_post_ra>
// kernel: tpu_custom_call.1
= control target key start
LH: loop header
LB: loop body
LE: loop exit
PB: predicated region body
PF: predicated region fallthrough
CT: control target
= control target key end

     0   :  { %s1493_s0 = inlined_call_operand.vmem [shape: bf16[16,1024], index: 0, kind: input, shape index: {}]   ;;  %s1494_s1 = inlined_call_operand.vmem [shape: bf16[1024,16], index: 1, kind: input, shape index: {}]   ;;  %s1495_s2 = inlined_call_operand.vmem [shape: f32[1,16], index: 2, kind: input, shape index: {}]   ;;  %s1496_s3 = inlined_call_operand.vmem [shape: bf16[16,32], index: 3, kind: input, shape index: {}]   ;;  %s1497_s4 = inlined_call_operand.vmem [shape: f32[1,32], index: 4, kind: input, shape index: {}]   ;;  %s1498_s5 = inlined_call_operand.vmem [shape: bf16[32,128], index: 5, kind: input, shape index: {}]   ;;  %s1499_s6 = inlined_call_operand.vmem [shape: f32[1,128], index: 6, kind: input, shape index: {}]   ;;  %s1500_s7 = inlined_call_operand.hbm [shape: f32[16,128], index: 7, kind: output, shape index: {}]  }
   0x1   :  { %v1111_v0 = vld [vmem:[%s1494_s1 + $0x40] sm:$0xff]   ;;  %v1115_v4 = vld [vmem:[%s1494_s1 + $0x48] sm:$0xff]   ;;  %v1119_v8 = vld [vmem:[%s1494_s1 + $0x50] sm:$0xff]  }
   0x2   :  { %v1112_v1 = vld [vmem:[%s1494_s1 + $0xc0] sm:$0xff]   ;;  %999 = vmatprep.subr.bf16.mxu0 %v1111_v0  ;;  %v1116_v5 = vld [vmem:[%s1494_s1 + $0xc8] sm:$0xff]   ;;  %v1120_v9 = vld [vmem:[%s1494_s1 + $0xd0] sm:$0xff]  }
   0x3   :  { %v1113_v2 = vld [vmem:[%s1494_s1] sm:$0xff]   ;;  %1021 = vmatprep.subr.bf16.mxu1 %v1112_v1  ;;  %v1117_v6 = vld [vmem:[%s1494_s1 + $0x8] sm:$0xff]   ;;  %v1121_v10 = vld [vmem:[%s1494_s1 + $0x10] sm:$0xff]  }
   0x4   :  { %v1114_v3 = vld [vmem:[%s1494_s1 + $0x80] sm:$0xff]   ;;  %1000 = vmatpush3.bf16.msra.mxu0 %v1113_v2  ;;  %v1118_v7 = vld [vmem:[%s1494_s1 + $0x88] sm:$0xff]   ;;  %v1122_v11 = vld [vmem:[%s1494_s1 + $0x90] sm:$0xff]  }
   0x5   :  { %1022 = vmatpush3.bf16.msra.mxu1 %v1114_v3  ;;  %1001 = vmatprep.subr.bf16.mxu0 %v1115_v4  ;;  %v1123_v12 = vld [vmem:[%s1494_s1 + $0x58] sm:$0xff]   ;;  %v1127_v16 = vld [vmem:[%s1494_s1 + $0x60] sm:$0xff]   ;;  %v1131_v20 = vld [vmem:[%s1494_s1 + $0x68] sm:$0xff]  }
   0x6   :  { %1023 = vmatprep.subr.bf16.mxu1 %v1116_v5  ;;  %v1124_v13 = vld [vmem:[%s1494_s1 + $0xd8] sm:$0xff]   ;;  %v1128_v17 = vld [vmem:[%s1494_s1 + $0xe0] sm:$0xff]   ;;  %v1132_v21 = vld [vmem:[%s1494_s1 + $0xe8] sm:$0xff]  }
   0x7   :  { %v1125_v14 = vld [vmem:[%s1494_s1 + $0x18] sm:$0xff]   ;;  %v1129_v18 = vld [vmem:[%s1494_s1 + $0x20] sm:$0xff]   ;;  %v1133_v22 = vld [vmem:[%s1494_s1 + $0x28] sm:$0xff]  }
   0x8   :  { %1002 = vmatpush3.bf16.msra.mxu0 %v1117_v6  ;;  %v1126_v15 = vld [vmem:[%s1494_s1 + $0x98] sm:$0xff]   ;;  %v1130_v19 = vld [vmem:[%s1494_s1 + $0xa0] sm:$0xff]   ;;  %v1134_v23 = vld [vmem:[%s1494_s1 + $0xa8] sm:$0xff]  }
   0x9   :  { %1024 = vmatpush3.bf16.msra.mxu1 %v1118_v7  ;;  %1003 = vmatprep.subr.bf16.mxu0 %v1119_v8  ;;  %v1135_v24 = vld [vmem:[%s1494_s1 + $0x70] sm:$0xff]   ;;  %v1139_v28 = vld [vmem:[%s1494_s1 + $0x78] sm:$0xff]   ;;  %v28_v32 = vld [vmem:[%s1493_s0] sm:$0xff] }
   0xa   :  { %1025 = vmatprep.subr.bf16.mxu1 %v1120_v9  ;;  %v1136_v25 = vld [vmem:[%s1494_s1 + $0xf0] sm:$0xff]   ;;  %v1140_v29 = vld [vmem:[%s1494_s1 + $0xf8] sm:$0xff]   ;;  %v32_v33 = vld [vmem:[%s1493_s0 + $0x20] sm:$0xff] }
   0xb   :  { %v1137_v26 = vld [vmem:[%s1494_s1 + $0x30] sm:$0xff]   ;;  %v1141_v30 = vld [vmem:[%s1494_s1 + $0x38] sm:$0xff]   ;;  %v29_v34 = vld [vmem:[%s1493_s0 + $0x8] sm:$0xff]  ;;  %v920_v35 = vcombine.low %v28_v32, %v32_v33  ;;  %v921_v36 = vcombine.high %v28_v32, %v32_v33 }
   0xc   :  { %1004 = vmatpush3.bf16.msra.mxu0 %v1121_v10  ;;  %v1138_v27 = vld [vmem:[%s1494_s1 + $0xb0] sm:$0xff]   ;;  %v1142_v31 = vld [vmem:[%s1494_s1 + $0xb8] sm:$0xff]   ;;  %v33_v37 = vld [vmem:[%s1493_s0 + $0x28] sm:$0xff] }
   0xd   :  { %1026 = vmatpush3.bf16.msra.mxu1 %v1122_v11  ;;  %1005 = vmatprep.subr.bf16.mxu0 %v1123_v12  ;;  %v922_v38 = vcombine.low %v29_v34, %v33_v37  ;;  %v923_v39 = vcombine.high %v29_v34, %v33_v37  ;;  %v1143_v40 = vld [vmem:[%s1494_s1 + $0x140] sm:$0xff]   ;;  %v1147_v44 = vld [vmem:[%s1494_s1 + $0x148] sm:$0xff]   ;;  %v1151_v48 = vld [vmem:[%s1494_s1 + $0x150] sm:$0xff]  }
   0xe   :  { %1027 = vmatprep.subr.bf16.mxu1 %v1124_v13  ;;  %627 = vmatprep.mubr.bf16.mxu0 %v921_v36  ;;  %v1144_v41 = vld [vmem:[%s1494_s1 + $0x1c0] sm:$0xff]   ;;  %v1148_v45 = vld [vmem:[%s1494_s1 + $0x1c8] sm:$0xff]   ;;  %v1152_v49 = vld [vmem:[%s1494_s1 + $0x1d0] sm:$0xff]  }
   0xf   :  { %668 = vmatprep.mubr.bf16.mxu1 %v923_v39  ;;  %v1145_v42 = vld [vmem:[%s1494_s1 + $0x100] sm:$0xff]   ;;  %v1149_v46 = vld [vmem:[%s1494_s1 + $0x108] sm:$0xff]   ;;  %v1153_v50 = vld [vmem:[%s1494_s1 + $0x110] sm:$0xff]  }
  0x10   :  { %1006 = vmatpush3.bf16.msra.mxu0 %v1125_v14  ;;  %v1146_v43 = vld [vmem:[%s1494_s1 + $0x180] sm:$0xff]   ;;  %v1150_v47 = vld [vmem:[%s1494_s1 + $0x188] sm:$0xff]   ;;  %v1154_v51 = vld [vmem:[%s1494_s1 + $0x190] sm:$0xff]  }
  0x11   :  { %1028 = vmatpush3.bf16.msra.mxu1 %v1126_v15  ;;  %1007 = vmatprep.subr.bf16.mxu0 %v1127_v16  ;;  %v1155_v52 = vld [vmem:[%s1494_s1 + $0x158] sm:$0xff]   ;;  %v1159_v56 = vld [vmem:[%s1494_s1 + $0x160] sm:$0xff]   ;;  %v1163_v60 = vld [vmem:[%s1494_s1 + $0x168] sm:$0xff]  }
  0x12   :  { %1029 = vmatprep.subr.bf16.mxu1 %v1128_v17  ;;  %v1156_v53 = vld [vmem:[%s1494_s1 + $0x1d8] sm:$0xff]   ;;  %v1160_v57 = vld [vmem:[%s1494_s1 + $0x1e0] sm:$0xff]   ;;  %v1164_v61 = vld [vmem:[%s1494_s1 + $0x1e8] sm:$0xff]  }
  0x13   :  { %v1157_v54 = vld [vmem:[%s1494_s1 + $0x118] sm:$0xff]   ;;  %v1161_v58 = vld [vmem:[%s1494_s1 + $0x120] sm:$0xff]   ;;  %v1165_v62 = vld [vmem:[%s1494_s1 + $0x128] sm:$0xff]  }
  0x14   :  { %1008 = vmatpush3.bf16.msra.mxu0 %v1129_v18  ;;  %v1158_v55 = vld [vmem:[%s1494_s1 + $0x198] sm:$0xff]   ;;  %v1162_v59 = vld [vmem:[%s1494_s1 + $0x1a0] sm:$0xff]   ;;  %v1166_v63 = vld [vmem:[%s1494_s1 + $0x1a8] sm:$0xff]  }
  0x15   :  { %1030 = vmatpush3.bf16.msra.mxu1 %v1130_v19  ;;  %1009 = vmatprep.subr.bf16.mxu0 %v1131_v20  ;;  %v1167_v0 = vld [vmem:[%s1494_s1 + $0x170] sm:$0xff]   ;;  %v1171_v4 = vld [vmem:[%s1494_s1 + $0x178] sm:$0xff]  }
  0x16   :  { %1031 = vmatprep.subr.bf16.mxu1 %v1132_v21  ;;  %v1168_v1 = vld [vmem:[%s1494_s1 + $0x1f0] sm:$0xff]   ;;  %v1172_v5 = vld [vmem:[%s1494_s1 + $0x1f8] sm:$0xff]  }
  0x17   :  { %v1169_v2 = vld [vmem:[%s1494_s1 + $0x130] sm:$0xff]   ;;  %v1173_v6 = vld [vmem:[%s1494_s1 + $0x138] sm:$0xff]  }
  0x18   :  { %1010 = vmatpush3.bf16.msra.mxu0 %v1133_v22  ;;  %v1170_v3 = vld [vmem:[%s1494_s1 + $0x1b0] sm:$0xff]   ;;  %v1174_v7 = vld [vmem:[%s1494_s1 + $0x1b8] sm:$0xff]  }
  0x19   :  { %1032 = vmatpush3.bf16.msra.mxu1 %v1134_v23  ;;  %1011 = vmatprep.subr.bf16.mxu0 %v1135_v24  ;;  %v30_v8 = vld [vmem:[%s1493_s0 + $0x10] sm:$0xff]  ;;  %v31_v12 = vld [vmem:[%s1493_s0 + $0x18] sm:$0xff] }
  0x1a   :  { %1033 = vmatprep.subr.bf16.mxu1 %v1136_v25  ;;  %v34_v9 = vld [vmem:[%s1493_s0 + $0x30] sm:$0xff]  ;;  %v35_v13 = vld [vmem:[%s1493_s0 + $0x38] sm:$0xff] }
  0x1b   :  { %v924_v10 = vcombine.low %v30_v8, %v34_v9  ;;  %v925_v11 = vcombine.high %v30_v8, %v34_v9  ;;  %v926_v14 = vcombine.low %v31_v12, %v35_v13  ;;  %v927_v15 = vcombine.high %v31_v12, %v35_v13 }
  0x1c   :  { %1012 = vmatpush3.bf16.msra.mxu0 %v1137_v26 }
  0x1d   :  { %1034 = vmatpush3.bf16.msra.mxu1 %v1138_v27  ;;  %1013 = vmatprep.subr.bf16.mxu0 %v1139_v28 }
  0x1e   :  { %1035 = vmatprep.subr.bf16.mxu1 %v1140_v29 }
  0x20   :  { %1014 = vmatpush3.bf16.msra.mxu0 %v1141_v30 }
  0x21   :  { %1036 = vmatpush3.bf16.msra.mxu1 %v1142_v31  ;;  %1043 = vmatprep.subr.bf16.mxu0 %v1143_v40 }
  0x22   :  { %1065 = vmatprep.subr.bf16.mxu1 %v1144_v41 }
  0x23   :  { %628 = vmatmul.mubr.bf16.vlgmr.msra.gmra.mrb[0].mxu0 %v920_v35 }
  0x24   :  { %669 = vmatmul.mubr.bf16.vlgmr.msra.gmra.mrb[0].mxu1 %v922_v38  ;;  %1044 = vmatpush3.bf16.msra.mxu0 %v1145_v42 }
  0x25   :  { %1066 = vmatpush3.bf16.msra.mxu1 %v1146_v43  ;;  %1045 = vmatprep.subr.bf16.mxu0 %v1147_v44 }
  0x26   :  { %1067 = vmatprep.subr.bf16.mxu1 %v1148_v45  ;;  %709 = vmatprep.mubr.bf16.mxu0 %v925_v11 }
  0x28   :  { %1046 = vmatpush3.bf16.msra.mxu0 %v1149_v46 }
  0x29   :  { %1068 = vmatpush3.bf16.msra.mxu1 %v1150_v47  ;;  %1047 = vmatprep.subr.bf16.mxu0 %v1151_v48 }
  0x2a   :  { %1069 = vmatprep.subr.bf16.mxu1 %v1152_v49 }
  0x2c   :  { %1048 = vmatpush3.bf16.msra.mxu0 %v1153_v50 }
  0x2d   :  { %1070 = vmatpush3.bf16.msra.mxu1 %v1154_v51  ;;  %1049 = vmatprep.subr.bf16.mxu0 %v1155_v52 }
  0x2e   :  { %1071 = vmatprep.subr.bf16.mxu1 %v1156_v53 }
  0x30   :  { %1050 = vmatpush3.bf16.msra.mxu0 %v1157_v54 }
  0x31   :  { %1072 = vmatpush3.bf16.msra.mxu1 %v1158_v55  ;;  %1051 = vmatprep.subr.bf16.mxu0 %v1159_v56 }
  0x32   :  { %1073 = vmatprep.subr.bf16.mxu1 %v1160_v57 }
  0x34   :  { %1052 = vmatpush3.bf16.msra.mxu0 %v1161_v58 }
  0x35   :  { %1074 = vmatpush3.bf16.msra.mxu1 %v1162_v59  ;;  %1053 = vmatprep.subr.bf16.mxu0 %v1163_v60 }
  0x36   :  { %1075 = vmatprep.subr.bf16.mxu1 %v1164_v61 }
  0x38   :  { %1054 = vmatpush3.bf16.msra.mxu0 %v1165_v62 }
  0x39   :  { %1076 = vmatpush3.bf16.msra.mxu1 %v1166_v63  ;;  %1055 = vmatprep.subr.bf16.mxu0 %v1167_v0 }
  0x3a   :  { %1077 = vmatprep.subr.bf16.mxu1 %v1168_v1 }
  0x3c   :  { %1056 = vmatpush3.bf16.msra.mxu0 %v1169_v2 }
  0x3d   :  { %1078 = vmatpush3.bf16.msra.mxu1 %v1170_v3  ;;  %1057 = vmatprep.subr.bf16.mxu0 %v1171_v4 }
  0x3e   :  { %1079 = vmatprep.subr.bf16.mxu1 %v1172_v5 }
  0x40   :  { %1058 = vmatpush3.bf16.msra.mxu0 %v1173_v6 }
  0x41   :  { %1080 = vmatpush3.bf16.msra.mxu1 %v1174_v7 }
  0x42   :  { %12 = vsyncpa [#allocation3], 0  ;;  %750 = vmatprep.mubr.bf16.mxu1 %v927_v15  ;;  %v1175_v16 = vld [vmem:[%s1496_s3] sm:$0xff]   ;;  %v1202_v17 = vmov 0.0   ;;  %vm1203_vm0 = vmmov 0   ;;  %vm781_vm3 = vcmask 130048  }
  0x43   :  { %710 = vmatmul.mubr.bf16.vlgmr.msra.gmra.mrb[4].mxu0 %v924_v10  ;;  %1092 = vmatprep.subr.bf16.mxu0 %v1202_v17  ;;  %v919_v20 = vld [vmem:[%s1495_s2] ss:$0 sm:$0xff]  ;;  %v1177_v57 = vld [vmem:[%s1498_s5 + $0x8] sm:$0xff]   ;;  %vm856_vm6 = vcmask 261120  }
  0x44   :  { %751 = vmatmul.mubr.bf16.vlgmr.msra.gmra.mrb[4].mxu1 %v926_v14  ;;  %1098 = vmatprep.subr.bf16.mxu1 %v1202_v17  ;;  %v1176_v56 = vld [vmem:[%s1498_s5] sm:$0xff]  }
  0x45   :  { %1093 = vmatpush3.bf16.msra.mxu0 %v1175_v16  ;;  %1094 = vmatprep.mubr.msk.bf16.mxu0 %vm1203_vm0, %v1202_v17  ;;  %v992_v58 = vld [vmem:[%s1497_s4] ss:$0 sm:$0xff]  ;;  %s1204_s4 = smov [#allocation2]  }
  0x46   :  { %1102 = vmatprep.mubr.msk.bf16.mxu1 %vm1203_vm0, %v1202_v17  ;;  %1099 = vmatpush3.bf16.msra.mxu1 %v1176_v56  ;;  %v995_v6 = vld [vmem:[%s1499_s6] ss:$0 sm:$0xff]  ;;  %s908_s14 = sshll.u32 %s1204_s4, 4  ;;  %s909_s14 = int_to_ptr.vmem [resolvable:$true] %s908_s14 }
  0x47   :  { %1100 = vmatprep.subr.bf16.mxu1 %v1202_v17  ;;  %s1178_s15 = scalar_lea.vmem %s909_s14, 256  ;;  %p1183_p1 = scmp.lt.s32.totalorder %s909_s14, %s909_s14 }
  0x48   :  { %p1179_p0 = scmp.ne.s32.totalorder %s909_s14, %s1178_s15  ;;  %p1184_p2 = scmp.lt.s32.totalorder %s1178_s15, %s1178_s15 }
  0x4a   :  { %1101 = vmatpush3.bf16.msra.mxu1 %v1177_v57  ;;  %p1185_p3 = por %p1184_p2, %p1183_p1 }
  0x4c   :  { %p1186_p4 = pnand %p1185_p3, %p1179_p0 }
  0xf6   :  { %v1015_v18 = vpop.f32.mrb[0].mxu0 }
  0xf7   :  { %v1037_v19 = vpop.f32.mrb[0].mxu1  ;;  %v1016_v21 = vpop.f32.mrb[1].mxu0 }
  0xf8   :  { %v1017_v22 = vadd.f32 %v1016_v21, %v1015_v18  ;;  %v1038_v23 = vpop.f32.mrb[1].mxu1  ;;  %v1018_v24 = vpop.f32.mrb[2].mxu0 }
  0xf9   :  { %v1039_v25 = vadd.f32 %v1038_v23, %v1037_v19  ;;  %v1040_v26 = vpop.f32.mrb[2].mxu1  ;;  %v1019_v27 = vpop.f32.mrb[3].mxu0 }
  0xfa   :  { %v630_v28 = vadd.f32 %v1017_v22, %v919_v20  ;;  %v1020_v29 = vadd.f32 %v1019_v27, %v1018_v24  ;;  %v1041_v30 = vpop.f32.mrb[3].mxu1 }
  0xfb   :  { %v1042_v31 = vadd.f32 %v1041_v30, %v1040_v26 }
  0xfc   :  { %v671_v32 = vadd.f32 %v1039_v25, %v630_v28  ;;  %v633_v33 = vadd.f32 %v1020_v29, %v919_v20 }
  0xfe   :  { %v674_v34 = vadd.f32 %v1042_v31, %v633_v33 }
 0x116   :  { %v1059_v35 = vpop.f32.mrb[4].mxu0 }
 0x117   :  { %v1081_v36 = vpop.f32.mrb[4].mxu1  ;;  %v1060_v37 = vpop.f32.mrb[5].mxu0 }
 0x118   :  { %v1061_v38 = vadd.f32 %v1060_v37, %v1059_v35  ;;  %v1082_v39 = vpop.f32.mrb[5].mxu1  ;;  %v1062_v40 = vpop.f32.mrb[6].mxu0 }
 0x119   :  { %v1083_v41 = vadd.f32 %v1082_v39, %v1081_v36  ;;  %v1084_v42 = vpop.f32.mrb[6].mxu1  ;;  %v1063_v43 = vpop.f32.mrb[7].mxu0 }
 0x11a   :  { %v712_v44 = vadd.f32 %v1061_v38, %v671_v32  ;;  %v1064_v45 = vadd.f32 %v1063_v43, %v1062_v40  ;;  %v1085_v46 = vpop.f32.mrb[7].mxu1 }
 0x11b   :  { %v1086_v47 = vadd.f32 %v1085_v46, %v1084_v42 }
 0x11c   :  { %v753_v48 = vadd.f32 %v1083_v41, %v712_v44  ;;  %v715_v49 = vadd.f32 %v1064_v45, %v674_v34 }
 0x11e   :  { %v761_v50 = vmul.f32 0.01, %v753_v48  ;;  %v756_v51 = vadd.f32 %v1086_v47, %v715_v49  ;;  %vm759_vm1 = vcmp.gt.f32.partialorder %v753_v48, 0.0 }
 0x120   :  { %vm760_vm2 = vcmp.gt.f32.partialorder %v756_v51, 0.0  ;;  %v762_v52 = vmul.f32 0.01, %v756_v51  ;;  %v763_v53 = vsel %vm759_vm1, %v753_v48, %v761_v50 }
 0x122   :  { %v764_v54 = vsel %vm760_vm2, %v756_v51, %v762_v52 }
 0x123   :  { %v765_v55 = vpack.c.bf16 %v764_v54, %v763_v53 }
 0x125   :  { %1095 = vmatmul.mubr.msk.bf16.vlgmr.msra.gmra.mrb[8].mxu0 %vm781_vm3, %v765_v55 }
 0x1f8   :  { %v819_v59 = vpop.f32.mrb[8].mxu0 }
 0x1f9   :  { %v820_v60 = vadd.f32 %v992_v58, %v819_v59  ;;  %v1096_v61 = vpop.f32.mrb[9].mxu0 }
 0x1fa   :  { %v822_v62 = vpop.f32.mrb[10].mxu0 }
 0x1fb   :  { %v828_v63 = vmul.f32 0.01, %v820_v60  ;;  %v823_v0 = vadd.f32 %v992_v58, %v822_v62  ;;  %v1097_v1 = vpop.f32.mrb[11].mxu0  ;;  %vm826_vm4 = vcmp.gt.f32.partialorder %v820_v60, 0.0 }
 0x1fd   :  { %vm827_vm5 = vcmp.gt.f32.partialorder %v823_v0, 0.0  ;;  %v829_v2 = vmul.f32 0.01, %v823_v0  ;;  %v830_v3 = vsel %vm826_vm4, %v820_v60, %v828_v63 }
 0x1ff   :  { %v831_v4 = vsel %vm827_vm5, %v823_v0, %v829_v2 }
 0x200   :  { %v832_v5 = vpack.c.bf16 %v831_v4, %v830_v3 }
 0x202   :  { %1103 = vmatmul.mubr.msk.bf16.vlgmr.msra.gmra.mrb[8].mxu1 %vm856_vm6, %v832_v5 }
 0x2d5   :  { %v894_v7 = vpop.f32.mrb[8].mxu1 }
 0x2d6   :  { %v895_v8 = vadd.f32 %v995_v6, %v894_v7  ;;  %v1104_v9 = vpop.f32.mrb[9].mxu1 }
 0x2d7   :  { %v897_v10 = vpop.f32.mrb[10].mxu1 }
 0x2d8   :  { %901 = vst [vmem:[#allocation2] sm:$0xff] %v895_v8  ;;  %v898_v11 = vadd.f32 %v995_v6, %v897_v10  ;;  %v1105_v12 = vpop.f32.mrb[11].mxu1 }
 0x2da   :  { %902 = vst [vmem:[#allocation2 + $0x8] sm:$0xff] %v898_v11 }
 0x2db   :  { %1189 = shalt.err (!%p1186_p4)
}
 0x2dc   :  { %s1190_s17 = scalar_lea.hbm %s1500_s7, 256 }
 0x2dd   :  { %p1191_p5 = scmp.ne.s32.totalorder %s1500_s7, %s1190_s17  ;;  %p1194_p6 = scmp.lt.u32.totalorder %s1190_s17, %s1500_s7 }
 0x2df   :  { %p1196_p7 = pnand %p1194_p6, %p1191_p5 }
 0x2e1   :  { %1199 = shalt.err (!%p1196_p7)
}
 0x2e2   :  { %s1205_s22 = smov 128   ;;  %s1206_s23 = smov 8  }
 0x2e3   :  { %914 = dma.vmem_to_hbm [thread:$0]  %s909_s14, 256, %s1500_s7, [#allocation3], %s1205_s22, %s1205_s22, %s1206_s23  }
 0x2e4   :  { %1200 = dma.done.wait [#allocation3], 256  }
 0x2e5   :  { %1201 = vsyncadd [#allocation3], 4294967040 }
 0x2e6   :  { %918 = vsyncpa [#allocation3], 1 }

</bundles_post_ra>
